<compile_context>
chip_gen: v5e
topology: v5e:2x2
jax: 0.10.0
libtpu: 0.0.40
codegen_flags: <defaults>
</compile_context>

<pallas_src>
import jax
import jax.numpy as jnp
from jax.experimental import pallas as pl
from jax.experimental.pallas import tpu as pltpu


_LANE = 128     # TPU lane width (fast, last vreg dim)
_SUBLANE = 8    # TPU sublane count (second-to-last vreg dim)


def _decoder_copy_kernel(x_ref, o_ref):
    # Parameter-free forward of the abstract base: identity on the tile.
    # TODO(synk): concrete Decoder subclasses replace this with real compute.
    o_ref[...] = x_ref[...]


def _tpu_budgets():
    """(per-block byte budget, vmem_limit_bytes), generation-aware.

    Live VMEM = 4 buffers (input + output, each double-buffered), so the
    budget is sized to keep 4 * block_bytes comfortably under the limit."""
    vmem_bytes = 0
    try:
        vmem_bytes = int(getattr(pltpu.get_tpu_info(), "vmem_capacity_bytes", 0))
    except Exception:
        vmem_bytes = 0
    if vmem_bytes >= (128 << 20):
        # v5e / v6e: 128 MiB physical VMEM; raise the scoped limit explicitly.
        return 8 << 20, 64 << 20
    if vmem_bytes >= (64 << 20):
        # v7x: 64 MiB physical per TC; 4 x 8 MiB buffers + headroom.
        return 8 << 20, 40 << 20
    # Unknown chip / interpret mode: conservative, safe everywhere.
    return 2 << 20, 32 << 20


def _lane_dense_2d(shape):
    """Factor the flattened array into (rows, cols) with cols a multiple of
    128 (lane-dense) whenever some trailing-dim product allows it."""
    total = 1
    for d in shape:
        total *= int(d)
    cols = 1
    for d in reversed(shape):
        cols *= int(d)
        if cols % _LANE == 0:
            return total // cols, cols
    # Nothing lane-dense; fall back to a single row (full-extent block or
    # 128-multiple column tiles with a masked remainder).
    return 1, total


def _choose_tiling(rows, cols, itemsize, block_bytes):
    """Pick (block_rows, block_cols) under the per-block byte budget.

    Prefers full-width row tiles (lane-dense vst); falls back to column
    tiling in 128-lane multiples for flat/wide inputs."""
    strip_rows = rows if rows <= _SUBLANE else _SUBLANE
    strip_bytes = strip_rows * cols * itemsize

    if strip_bytes > block_bytes and cols > _LANE:
        # Wide/flat input: a single sublane strip at full width would not fit
        # the budget.  Tile columns in 128-lane multiples; the partial last
        # block (if cols is not a multiple of block_cols) is masked by Pallas.
        max_cols = max(_LANE, block_bytes // max(1, strip_rows * itemsize))
        block_cols = max(_LANE, (max_cols // _LANE) * _LANE)
        return strip_rows, min(block_cols, cols)

    if rows <= _SUBLANE:
        # Tiny row count and the whole thing fits: one full-extent block.
        return rows, cols

    bytes_per_row = cols * itemsize
    max_rows = max(_SUBLANE, block_bytes // max(1, bytes_per_row))
    block_rows = min(rows, max(_SUBLANE, (max_rows // _SUBLANE) * _SUBLANE))

    # v7x megacore: if one block would cover a non-trivial array, split into
    # two grid steps so both TensorCores get work (each half >= ~1 MiB).
    total_bytes = rows * cols * itemsize
    if block_rows >= rows and total_bytes >= (2 << 20) and rows >= 2 * _SUBLANE:
        half = (rows + 1) // 2
        block_rows = ((half + _SUBLANE - 1) // _SUBLANE) * _SUBLANE

    return min(block_rows, rows), cols


def decoder_copy_pallas(x):
    """Tiled, pipelined pass-through of `x` as a Pallas kernel.

    This is the template a concrete Decoder subclass would fill with real
    compute; for the abstract base the fast path (`decoder_forward`) simply
    returns `x` and never launches it."""
    orig_shape = x.shape
    rows, cols = _lane_dense_2d(orig_shape)
    x2d = x.reshape(rows, cols)  # contiguous, metadata-only reshape

    block_bytes, vmem_limit = _tpu_budgets()
    block_rows, block_cols = _choose_tiling(rows, cols, x.dtype.itemsize, block_bytes)
    grid = (pl.cdiv(rows, block_rows), pl.cdiv(cols, block_cols))

    y2d = pl.pallas_call(
        _decoder_copy_kernel,
        out_shape=jax.ShapeDtypeStruct((rows, cols), x.dtype),
        grid=grid,
        in_specs=[pl.BlockSpec((block_rows, block_cols), lambda i, j: (i, j))],
        out_specs=pl.BlockSpec((block_rows, block_cols), lambda i, j: (i, j)),
        compiler_params=pltpu.CompilerParams(
            dimension_semantics=("parallel", "parallel"),
            vmem_limit_bytes=vmem_limit,
        ),
        cost_estimate=pl.CostEstimate(
            flops=0,
            transcendentals=0,
            bytes_accessed=2 * rows * cols * x.dtype.itemsize,
        ),
    )(x2d)
    return y2d.reshape(orig_shape)


def decoder_forward(x, *, force_kernel=False):
    """Parameter-free forward of the abstract Decoder base.

    Fast path (default): the identity needs no data movement, so we return
    `x` unchanged — strictly faster than any copy kernel on every TPU
    generation.  `force_kernel=True` routes through the tiled Pallas template
    (used by tests / as the skeleton for concrete subclasses)."""
    if not force_kernel:
        return x
    return decoder_copy_pallas(x)


class Decoder:
    """JAX/Pallas mirror of the abstract PyTorch Decoder base class."""

    def __init__(self, *args, **kwargs):
        # Base class has no parameters.
        pass

    def init_state(self, enc_outputs, *args):
        # Abstract in the reference; the natural parameter-free realization is
        # to carry the encoder outputs forward as the state.
        # TODO(synk): concrete subclasses define their own state construction.
        return enc_outputs

    def forward(self, x, state):
        # Abstract in the reference (raises NotImplementedError there).  Here:
        # parameter-free pass-through; state carried unchanged.
        return decoder_forward(x), state

    def __call__(self, x, state):
        return self.forward(x, state)


if __name__ == "__main__":
    key = jax.random.PRNGKey(0)
    kx, ke = jax.random.split(key)

    batch, seq, hidden = 2, 8, 32
    x = jax.random.normal(kx, (batch, seq, hidden), dtype=jnp.float32)
    enc_outputs = jax.random.normal(ke, (batch, seq, hidden), dtype=jnp.float32)

    dec = Decoder()
    state = dec.init_state(enc_outputs)

    # Fast path (default forward): no kernel, x passes through untouched.
    y_fast, new_state = dec(x, state)
    y_fast = jax.block_until_ready(y_fast)
    new_state = jax.block_until_ready(new_state)

    # Kernel template path: run the tiled Pallas copy once and verify.
    y_kernel = jax.block_until_ready(decoder_copy_pallas(x))

    assert y_fast.shape == x.shape and y_fast.dtype == x.dtype
    assert y_kernel.shape == x.shape and y_kernel.dtype == x.dtype
    assert jnp.array_equal(y_fast, x)
    assert jnp.allclose(y_kernel, x)
    assert jnp.allclose(new_state, enc_outputs)

    print("KERNEL_OK")
</pallas_src>

<mosaic_0001>
module attributes {stable_mosaic.version = 11 : i64} {
  func.func @_decoder_copy_kernel(%arg0: i32, %arg1: i32, %arg2: memref<2x256xf32, #tpu.memory_space<vmem>>, %arg3: memref<2x256xf32, #tpu.memory_space<vmem>>) attributes {dimension_semantics = [#tpu.dimension_semantics<parallel>, #tpu.dimension_semantics<parallel>], iteration_bounds = array<i64: 1, 1>, scalar_prefetch = 0 : i64, scratch_operands = 0 : i64, tpu.core_type = #tpu.core_type<tc>, window_params = [{transform_indices = @transform_0, window_bounds = array<i64: 2, 256>}, {transform_indices = @transform_1, window_bounds = array<i64: 2, 256>}]} {
    %c0 = arith.constant 0 : index
    %c0_0 = arith.constant 0 : index
    %0 = vector.load %arg2[%c0, %c0_0] : memref<2x256xf32, #tpu.memory_space<vmem>>, vector<2x256xf32>
    %c0_1 = arith.constant 0 : index
    %c0_2 = arith.constant 0 : index
    %1 = vector.load %arg3[%c0_1, %c0_2] : memref<2x256xf32, #tpu.memory_space<vmem>>, vector<2x256xf32>
    tpu.vector_store %arg3[%c0_1, %c0_2], %0 {strides = array<i32>} : memref<2x256xf32, #tpu.memory_space<vmem>>, vector<2x256xf32>,
    return
  }
  func.func @transform_0(%arg0: i32, %arg1: i32) -> (i32, i32) {
    %c0_i32 = arith.constant 0 : i32
    return %arg0, %arg1 : i32, i32
  }
  func.func @transform_1(%arg0: i32, %arg1: i32) -> (i32, i32) {
    %c0_i32 = arith.constant 0 : i32
    return %arg0, %arg1 : i32, i32
  }
}

</mosaic_0001>

<bundles_post_ra>
// kernel: tpu_custom_call.1
= control target key start
LH: loop header
LB: loop body
LE: loop exit
PB: predicated region body
PF: predicated region fallthrough
CT: control target
= control target key end

     0   :  { %6 = vsyncpa [#allocation3], 0  ;;  %s114_s0 = inlined_call_operand.hbm [shape: f32[2,256], index: 0, kind: input, shape index: {}]   ;;  %s115_s1 = inlined_call_operand.hbm [shape: f32[2,256], index: 1, kind: output, shape index: {}]  }
   0x1   :  { %7 = vsyncpa [#allocation4], 0  ;;  %s13_s8 = sshll.u32 %s114_s0, 4  ;;  %s96_s9 = smov [#allocation2]   ;;  %s14_s8 = int_to_ptr.hbm [resolvable:$true] %s13_s8 }
   0x2   :  { %s15_s10 = sshll.u32 %s96_s9, 4  ;;  %s16_s10 = int_to_ptr.vmem [resolvable:$true] %s15_s10 }
   0x3   :  { %18 = dma.hbm_to_vmem [thread:$0]  %s14_s8, 64, %s16_s10, [#allocation3]  }
   0x4   :  { %92 = dma.done.wait [#allocation3], 64  }
   0x5   :  { %93 = vsyncadd [#allocation3], 4294967232  ;;  %s97_s11 = smov [#allocation5]   ;;  %s32_s15 = sshll.u32 %s115_s1, 4  ;;  %v23_v0 = vld [vmem:[#allocation2] sm:$0xf]  ;;  %s33_s15 = int_to_ptr.hbm [resolvable:$true] %s32_s15 }
   0x6   :  { %s30_s12 = sshll.u32 %s97_s11, 4  ;;  %24 = vst [vmem:[#allocation5] sm:$0xf] %v23_v0  ;;  %s31_s12 = int_to_ptr.vmem [resolvable:$true] %s30_s12 }
   0x7   :  { %35 = dma.vmem_to_hbm [thread:$0]  %s31_s12, 64, %s33_s15, [#allocation4]  }
   0x8   :  { %94 = dma.done.wait [#allocation4], 64  }
   0x9   :  { %95 = vsyncadd [#allocation4], 4294967232 }
   0xa   :  { %40 = vsyncpa [#allocation3], 1 }
   0xb   :  { %41 = vsyncpa [#allocation4], 1 }

</bundles_post_ra>
